<compile_context>
chip_gen: v6e
topology: v6e:2x2x1
jax: 0.10.0
libtpu: 0.0.40
codegen_flags: <defaults>
</compile_context>

<pallas_src>
import functools
import math

import jax
import jax.numpy as jnp
from jax.experimental import pallas as pl
from jax.experimental.pallas import tpu as pltpu


# ----------------------------- fused kernel --------------------------------

def _fused_mlp_self_kernel(
    x_ref,                   # (B*S, E)
    mask_ref,                # (B*S, B*S)  additive batch-block mask (0 / -1e30)
    w_in_ref, b_in_ref,      # (E, 3E), (1, 3E)   (Q slice pre-scaled by 1/sqrt(D))
    w_out_ref, b_out_ref,    # (E, E),  (1, E)
    w1_ref, b1_ref,          # (E, H1)
    w2_ref, b2_ref,          # (H1, 2H)
    w4_ref, b4_ref,          # (2H, 4H)
    w5_ref, b5_ref,          # (4H, 2H)
    w6_ref, b6_ref,          # (2H, H1)
    w3_ref, b3_ref,          # (H1, num_o)
    o_ref,                   # (S, num_o)
    *, batch, seq, num_heads, mxu_dtype,
):
    BS, E = x_ref.shape
    D = E // num_heads

    def matmul(a, w):
        return jnp.dot(a.astype(mxu_dtype), w.astype(mxu_dtype),
                       preferred_element_type=jnp.float32)

    def linear(a, w_ref, b_ref, relu=False):
        y = matmul(a, w_ref[...]) + b_ref[...]
        if relu:
            y = jnp.maximum(y, 0.0)
        return y

    x2d = x_ref[...].astype(jnp.float32)                     # (BS, E)

    # ---- attention in-projection: one wide matmul produces Q, K, V ----
    # (softmax scale already folded into the Q columns host-side)
    qkv = linear(x2d, w_in_ref, b_in_ref)                    # (BS, 3E)
    q = qkv[:, 0:E]
    k = qkv[:, E:2 * E]
    v = qkv[:, 2 * E:3 * E]

    mask = mask_ref[...]                                     # (BS, BS) additive mask

    # ---- per-head attention, accumulated directly into the out-projection ----
    # h_cur starts as residual + out_proj bias; each head adds
    # (softmax(QK^T + mask) @ V_h) @ W_out[h*D:(h+1)*D, :]   (MXU accumulate,
    # sublane row-slices of W_out are free views -> no lane concat of heads).
    h_cur = x2d + b_out_ref[...]                             # (BS, E)
    for h in range(num_heads):                               # static, unrolled
        sl = slice(h * D, (h + 1) * D)
        qh = q[:, sl]
        kh = k[:, sl]
        vh = v[:, sl]
        s = jax.lax.dot_general(
            qh.astype(mxu_dtype), kh.astype(mxu_dtype),
            (((1,), (1,)), ((), ())),
            preferred_element_type=jnp.float32)               # (BS, BS)
        s = s + mask
        m = jnp.max(s, axis=-1, keepdims=True)
        p = jnp.exp(s - m)                                    # un-normalized probs
        denom = jnp.sum(p, axis=-1, keepdims=True)
        pv = jnp.dot(p.astype(mxu_dtype), vh.astype(mxu_dtype),
                     preferred_element_type=jnp.float32)      # (BS, D)
        # Deferred softmax normalization on the small (BS, D) tensor (EUP recip).
        head_out = pv * pl.reciprocal(denom, approx=True)
        h_cur = h_cur + matmul(head_out, w_out_ref[sl, :])    # accumulate via MXU

    # ---- MLP stack (all VMEM/vreg resident) ----
    h_cur = linear(h_cur, w1_ref, b1_ref, relu=True)
    h_cur = linear(h_cur, w2_ref, b2_ref, relu=True)
    h_cur = linear(h_cur, w4_ref, b4_ref, relu=True)
    h_cur = linear(h_cur, w5_ref, b5_ref, relu=True)
    h_cur = linear(h_cur, w6_ref, b6_ref, relu=True)
    h_cur = linear(h_cur, w3_ref, b3_ref, relu=False)         # (BS, num_o)

    # ---- mean over batch (dim 0), fused epilogue ----
    # TODO(synk): if num_o / S grow, compute into a lane-dense
    # (S, round_up(num_o, 128)) slab and slice in the wrapper to avoid vst.msk.
    acc = h_cur[0:seq, :]
    for b in range(1, batch):                                 # static, unrolled
        acc = acc + h_cur[b * seq:(b + 1) * seq, :]
    o_ref[...] = (acc * (1.0 / batch)).astype(o_ref.dtype)


# ----------------------------- wrapper --------------------------------------

def mlp_self_forward(params, x, num_heads, mxu_dtype=jnp.bfloat16):
    # x: (B, S, E), batch_first layout (matches the torch module).
    # mxu_dtype=jnp.float32 gives closest-to-torch numerics; bf16 (default) is the
    # native MXU operand dtype on v5e/v6e/v7x (f32 accumulation is kept either way).
    B, S, E = x.shape
    BS = B * S
    D = E // num_heads
    x2d = x.reshape(BS, E)             # layout no-op, no transpose
    num_o = params["linear3"][0].shape[1]

    def b2d(b):
        return b.reshape(1, -1)

    # Fold the 1/sqrt(D) softmax scale into the Q slice of the in-projection
    # (host/XLA side -- free relative to the kernel's critical path).
    scale = 1.0 / math.sqrt(D)
    w_in, b_in = params["in_proj"]
    w_in = jnp.concatenate([w_in[:, :E] * scale, w_in[:, E:]], axis=1)
    b_in = jnp.concatenate([b_in[:E] * scale, b_in[E:]], axis=0)

    # Additive batch-block mask: token i attends only within its batch element.
    row_b = jnp.arange(BS, dtype=jnp.int32) // S
    mask = jnp.where(row_b[:, None] == row_b[None, :],
                     jnp.float32(0.0), jnp.float32(-1e30))    # (BS, BS)

    args = [
        x2d,
        mask,
        w_in, b2d(b_in),
        params["out_proj"][0], b2d(params["out_proj"][1]),
        params["linear1"][0], b2d(params["linear1"][1]),
        params["linear2"][0], b2d(params["linear2"][1]),
        params["linear4"][0], b2d(params["linear4"][1]),
        params["linear5"][0], b2d(params["linear5"][1]),
        params["linear6"][0], b2d(params["linear6"][1]),
        params["linear3"][0], b2d(params["linear3"][1]),
    ]

    vmem = pl.BlockSpec(memory_space=pltpu.MemorySpace.VMEM)
    kernel = functools.partial(
        _fused_mlp_self_kernel,
        batch=B, seq=S, num_heads=num_heads, mxu_dtype=mxu_dtype)

    # Single fused, grid-less invocation: total weights + activations ≪ 1 MiB, so the
    # whole problem is VMEM-resident on v5e/v6e (128 MiB) and v7x (64 MiB) alike, and
    # it is latency-bound -> splitting across cores would be pure overhead.
    # TODO(synk): if B*S grows, add an M-tiled grid over B*S with
    # dimension_semantics=("parallel",) (uses v7x's 2nd TC), restructure the
    # batch-mean as a trailing "arbitrary" reduction axis with a resident
    # accumulator, and size tiles against v7x's 64 MiB VMEM with an explicit
    # pltpu.CompilerParams(vmem_limit_bytes=...).
    return pl.pallas_call(
        kernel,
        out_shape=jax.ShapeDtypeStruct((S, num_o), x.dtype),
        in_specs=[vmem] * len(args),
        out_specs=vmem,
    )(*args)


# ----------------------------- params ---------------------------------------

def init_params(key, num_i, num_h, num_o, num_heads):
    def lin(key, fan_in, fan_out):
        kw, kb = jax.random.split(key)
        lim = 1.0 / jnp.sqrt(fan_in)
        w = jax.random.uniform(kw, (fan_in, fan_out), jnp.float32, -lim, lim)
        b = jax.random.uniform(kb, (fan_out,), jnp.float32, -lim, lim)
        return w, b

    keys = jax.random.split(key, 8)
    params = {}
    # MultiheadAttention: in_proj (E -> 3E) and out_proj (E -> E)
    params["in_proj"] = lin(keys[0], num_i, 3 * num_i)
    params["out_proj"] = lin(keys[1], num_i, num_i)
    params["linear1"] = lin(keys[2], num_i, num_h)
    params["linear2"] = lin(keys[3], num_h, num_h * 2)
    params["linear4"] = lin(keys[4], num_h * 2, num_h * 4)
    params["linear5"] = lin(keys[5], num_h * 4, num_h * 2)
    params["linear6"] = lin(keys[6], num_h * 2, num_h)
    params["linear3"] = lin(keys[7], num_h, num_o)
    return params
    # NOTE: self.dropout is defined in __init__ but never applied in forward,
    # and nn.MultiheadAttention default dropout=0, so no dropout is needed.


# ----------------------------- main ------------------------------------------

if __name__ == "__main__":
    # Small shapes consistent with the module.
    B, S = 2, 8
    num_i, num_h, num_o, num_heads = 32, 32, 16, 4

    key = jax.random.PRNGKey(0)
    k_params, k_x = jax.random.split(key)
    params = init_params(k_params, num_i, num_h, num_o, num_heads)
    x = jax.random.normal(k_x, (B, S, num_i), dtype=jnp.float32)

    fwd = jax.jit(functools.partial(mlp_self_forward, num_heads=num_heads))
    out = fwd(params, x)
    out = jax.block_until_ready(out)
    assert out.shape == (S, num_o), out.shape
    print("KERNEL_OK")
</pallas_src>

<mosaic_0001>
module attributes {stable_mosaic.version = 11 : i64} {
  func.func @_fused_mlp_self_kernel(%arg0: memref<16x32xf32, #tpu.memory_space<vmem>>, %arg1: memref<16x16xf32, #tpu.memory_space<vmem>>, %arg2: memref<32x96xf32, #tpu.memory_space<vmem>>, %arg3: memref<1x96xf32, #tpu.memory_space<vmem>>, %arg4: memref<32x32xf32, #tpu.memory_space<vmem>>, %arg5: memref<1x32xf32, #tpu.memory_space<vmem>>, %arg6: memref<32x32xf32, #tpu.memory_space<vmem>>, %arg7: memref<1x32xf32, #tpu.memory_space<vmem>>, %arg8: memref<32x64xf32, #tpu.memory_space<vmem>>, %arg9: memref<1x64xf32, #tpu.memory_space<vmem>>, %arg10: memref<64x128xf32, #tpu.memory_space<vmem>>, %arg11: memref<1x128xf32, #tpu.memory_space<vmem>>, %arg12: memref<128x64xf32, #tpu.memory_space<vmem>>, %arg13: memref<1x64xf32, #tpu.memory_space<vmem>>, %arg14: memref<64x32xf32, #tpu.memory_space<vmem>>, %arg15: memref<1x32xf32, #tpu.memory_space<vmem>>, %arg16: memref<32x16xf32, #tpu.memory_space<vmem>>, %arg17: memref<1x16xf32, #tpu.memory_space<vmem>>, %arg18: memref<8x16xf32, #tpu.memory_space<vmem>>) attributes {dimension_semantics = [], scalar_prefetch = 0 : i64, scratch_operands = 0 : i64, tpu.core_type = #tpu.core_type<tc>} {
    %c0 = arith.constant 0 : index
    %c0_0 = arith.constant 0 : index
    %0 = vector.load %arg0[%c0, %c0_0] : memref<16x32xf32, #tpu.memory_space<vmem>>, vector<16x32xf32>
    %c0_1 = arith.constant 0 : index
    %c0_2 = arith.constant 0 : index
    %1 = vector.load %arg2[%c0_1, %c0_2] : memref<32x96xf32, #tpu.memory_space<vmem>>, vector<32x96xf32>
    %2 = arith.truncf %0 : vector<16x32xf32> to vector<16x32xbf16>
    %3 = arith.truncf %1 : vector<32x96xf32> to vector<32x96xbf16>
    %cst = arith.constant dense<0.000000e+00> : vector<16x96xf32>
    %4 = tpu.matmul %2, %3, %cst {dimension_numbers = #tpu.dot_dimension_numbers<[1], [0], [0], [1], [0, 0, 1, 1], [], []>} : vector<16x32xbf16>, vector<32x96xbf16>, vector<16x96xf32> -> vector<16x96xf32>
    %c0_3 = arith.constant 0 : index
    %c0_4 = arith.constant 0 : index
    %5 = vector.load %arg3[%c0_3, %c0_4] : memref<1x96xf32, #tpu.memory_space<vmem>>, vector<1x96xf32>
    %6 = vector.broadcast %5 : vector<1x96xf32> to vector<16x96xf32>
    %7 = arith.addf %4, %6 : vector<16x96xf32>
    %8 = vector.extract_strided_slice %7 {offsets = [0, 0], sizes = [16, 32], strides = [1, 1]} : vector<16x96xf32> to vector<16x32xf32>
    %9 = vector.extract_strided_slice %7 {offsets = [0, 32], sizes = [16, 32], strides = [1, 1]} : vector<16x96xf32> to vector<16x32xf32>
    %10 = vector.extract_strided_slice %7 {offsets = [0, 64], sizes = [16, 32], strides = [1, 1]} : vector<16x96xf32> to vector<16x32xf32>
    %c0_5 = arith.constant 0 : index
    %c0_6 = arith.constant 0 : index
    %11 = vector.load %arg1[%c0_5, %c0_6] : memref<16x16xf32, #tpu.memory_space<vmem>>, vector<16x16xf32>
    %c0_7 = arith.constant 0 : index
    %c0_8 = arith.constant 0 : index
    %12 = vector.load %arg5[%c0_7, %c0_8] : memref<1x32xf32, #tpu.memory_space<vmem>>, vector<1x32xf32>
    %13 = vector.broadcast %12 : vector<1x32xf32> to vector<16x32xf32>
    %14 = arith.addf %0, %13 : vector<16x32xf32>
    %15 = vector.extract_strided_slice %8 {offsets = [0, 0], sizes = [16, 8], strides = [1, 1]} : vector<16x32xf32> to vector<16x8xf32>
    %16 = vector.extract_strided_slice %9 {offsets = [0, 0], sizes = [16, 8], strides = [1, 1]} : vector<16x32xf32> to vector<16x8xf32>
    %17 = vector.extract_strided_slice %10 {offsets = [0, 0], sizes = [16, 8], strides = [1, 1]} : vector<16x32xf32> to vector<16x8xf32>
    %18 = arith.truncf %15 : vector<16x8xf32> to vector<16x8xbf16>
    %19 = arith.truncf %16 : vector<16x8xf32> to vector<16x8xbf16>
    %cst_9 = arith.constant dense<0.000000e+00> : vector<16x16xf32>
    %20 = tpu.matmul %18, %19, %cst_9 {dimension_numbers = #tpu.dot_dimension_numbers<[1], [1], [0], [0], [0, 0, 1, 0], [], []>} : vector<16x8xbf16>, vector<16x8xbf16>, vector<16x16xf32> -> vector<16x16xf32>
    %21 = arith.addf %20, %11 : vector<16x16xf32>
    %cst_10 = arith.constant dense<0xFF800000> : vector<16xf32>
    %22 = vector.multi_reduction <maximumf>, %21, %cst_10 [1] : vector<16x16xf32> to vector<16xf32>
    %23 = vector.shape_cast %22 : vector<16xf32> to vector<16x1xf32>
    %24 = vector.broadcast %23 : vector<16x1xf32> to vector<16x16xf32>
    %25 = arith.subf %21, %24 : vector<16x16xf32>
    %26 = math.exp %25 : vector<16x16xf32>
    %cst_11 = arith.constant dense<0.000000e+00> : vector<16xf32>
    %27 = vector.multi_reduction <add>, %26, %cst_11 [1] : vector<16x16xf32> to vector<16xf32>
    %28 = vector.shape_cast %27 : vector<16xf32> to vector<16x1xf32>
    %29 = arith.truncf %26 : vector<16x16xf32> to vector<16x16xbf16>
    %30 = arith.truncf %17 : vector<16x8xf32> to vector<16x8xbf16>
    %cst_12 = arith.constant dense<0.000000e+00> : vector<16x8xf32>
    %31 = tpu.matmul %29, %30, %cst_12 {dimension_numbers = #tpu.dot_dimension_numbers<[1], [0], [0], [1], [0, 0, 1, 1], [], []>} : vector<16x16xbf16>, vector<16x8xbf16>, vector<16x8xf32> -> vector<16x8xf32>
    %32 = tpu.reciprocal %28 {approx = true} : vector<16x1xf32> -> vector<16x1xf32>
    %33 = vector.broadcast %32 : vector<16x1xf32> to vector<16x8xf32>
    %34 = arith.mulf %31, %33 : vector<16x8xf32>
    %c0_13 = arith.constant 0 : index
    %c0_14 = arith.constant 0 : index
    %35 = vector.load %arg4[%c0_13, %c0_14] : memref<32x32xf32, #tpu.memory_space<vmem>>, vector<8x32xf32>
    %36 = arith.truncf %34 : vector<16x8xf32> to vector<16x8xbf16>
    %37 = arith.truncf %35 : vector<8x32xf32> to vector<8x32xbf16>
    %cst_15 = arith.constant dense<0.000000e+00> : vector<16x32xf32>
    %38 = tpu.matmul %36, %37, %cst_15 {dimension_numbers = #tpu.dot_dimension_numbers<[1], [0], [0], [1], [0, 0, 1, 1], [], []>} : vector<16x8xbf16>, vector<8x32xbf16>, vector<16x32xf32> -> vector<16x32xf32>
    %39 = arith.addf %14, %38 : vector<16x32xf32>
    %40 = vector.extract_strided_slice %8 {offsets = [0, 8], sizes = [16, 8], strides = [1, 1]} : vector<16x32xf32> to vector<16x8xf32>
    %41 = vector.extract_strided_slice %9 {offsets = [0, 8], sizes = [16, 8], strides = [1, 1]} : vector<16x32xf32> to vector<16x8xf32>
    %42 = vector.extract_strided_slice %10 {offsets = [0, 8], sizes = [16, 8], strides = [1, 1]} : vector<16x32xf32> to vector<16x8xf32>
    %43 = arith.truncf %40 : vector<16x8xf32> to vector<16x8xbf16>
    %44 = arith.truncf %41 : vector<16x8xf32> to vector<16x8xbf16>
    %cst_16 = arith.constant dense<0.000000e+00> : vector<16x16xf32>
    %45 = tpu.matmul %43, %44, %cst_16 {dimension_numbers = #tpu.dot_dimension_numbers<[1], [1], [0], [0], [0, 0, 1, 0], [], []>} : vector<16x8xbf16>, vector<16x8xbf16>, vector<16x16xf32> -> vector<16x16xf32>
    %46 = arith.addf %45, %11 : vector<16x16xf32>
    %cst_17 = arith.constant dense<0xFF800000> : vector<16xf32>
    %47 = vector.multi_reduction <maximumf>, %46, %cst_17 [1] : vector<16x16xf32> to vector<16xf32>
    %48 = vector.shape_cast %47 : vector<16xf32> to vector<16x1xf32>
    %49 = vector.broadcast %48 : vector<16x1xf32> to vector<16x16xf32>
    %50 = arith.subf %46, %49 : vector<16x16xf32>
    %51 = math.exp %50 : vector<16x16xf32>
    %cst_18 = arith.constant dense<0.000000e+00> : vector<16xf32>
    %52 = vector.multi_reduction <add>, %51, %cst_18 [1] : vector<16x16xf32> to vector<16xf32>
    %53 = vector.shape_cast %52 : vector<16xf32> to vector<16x1xf32>
    %54 = arith.truncf %51 : vector<16x16xf32> to vector<16x16xbf16>
    %55 = arith.truncf %42 : vector<16x8xf32> to vector<16x8xbf16>
    %cst_19 = arith.constant dense<0.000000e+00> : vector<16x8xf32>
    %56 = tpu.matmul %54, %55, %cst_19 {dimension_numbers = #tpu.dot_dimension_numbers<[1], [0], [0], [1], [0, 0, 1, 1], [], []>} : vector<16x16xbf16>, vector<16x8xbf16>, vector<16x8xf32> -> vector<16x8xf32>
    %57 = tpu.reciprocal %53 {approx = true} : vector<16x1xf32> -> vector<16x1xf32>
    %58 = vector.broadcast %57 : vector<16x1xf32> to vector<16x8xf32>
    %59 = arith.mulf %56, %58 : vector<16x8xf32>
    %c8 = arith.constant 8 : index
    %c0_20 = arith.constant 0 : index
    %60 = vector.load %arg4[%c8, %c0_20] : memref<32x32xf32, #tpu.memory_space<vmem>>, vector<8x32xf32>
    %61 = arith.truncf %59 : vector<16x8xf32> to vector<16x8xbf16>
    %62 = arith.truncf %60 : vector<8x32xf32> to vector<8x32xbf16>
    %cst_21 = arith.constant dense<0.000000e+00> : vector<16x32xf32>
    %63 = tpu.matmul %61, %62, %cst_21 {dimension_numbers = #tpu.dot_dimension_numbers<[1], [0], [0], [1], [0, 0, 1, 1], [], []>} : vector<16x8xbf16>, vector<8x32xbf16>, vector<16x32xf32> -> vector<16x32xf32>
    %64 = arith.addf %39, %63 : vector<16x32xf32>
    %65 = vector.extract_strided_slice %8 {offsets = [0, 16], sizes = [16, 8], strides = [1, 1]} : vector<16x32xf32> to vector<16x8xf32>
    %66 = vector.extract_strided_slice %9 {offsets = [0, 16], sizes = [16, 8], strides = [1, 1]} : vector<16x32xf32> to vector<16x8xf32>
    %67 = vector.extract_strided_slice %10 {offsets = [0, 16], sizes = [16, 8], strides = [1, 1]} : vector<16x32xf32> to vector<16x8xf32>
    %68 = arith.truncf %65 : vector<16x8xf32> to vector<16x8xbf16>
    %69 = arith.truncf %66 : vector<16x8xf32> to vector<16x8xbf16>
    %cst_22 = arith.constant dense<0.000000e+00> : vector<16x16xf32>
    %70 = tpu.matmul %68, %69, %cst_22 {dimension_numbers = #tpu.dot_dimension_numbers<[1], [1], [0], [0], [0, 0, 1, 0], [], []>} : vector<16x8xbf16>, vector<16x8xbf16>, vector<16x16xf32> -> vector<16x16xf32>
    %71 = arith.addf %70, %11 : vector<16x16xf32>
    %cst_23 = arith.constant dense<0xFF800000> : vector<16xf32>
    %72 = vector.multi_reduction <maximumf>, %71, %cst_23 [1] : vector<16x16xf32> to vector<16xf32>
    %73 = vector.shape_cast %72 : vector<16xf32> to vector<16x1xf32>
    %74 = vector.broadcast %73 : vector<16x1xf32> to vector<16x16xf32>
    %75 = arith.subf %71, %74 : vector<16x16xf32>
    %76 = math.exp %75 : vector<16x16xf32>
    %cst_24 = arith.constant dense<0.000000e+00> : vector<16xf32>
    %77 = vector.multi_reduction <add>, %76, %cst_24 [1] : vector<16x16xf32> to vector<16xf32>
    %78 = vector.shape_cast %77 : vector<16xf32> to vector<16x1xf32>
    %79 = arith.truncf %76 : vector<16x16xf32> to vector<16x16xbf16>
    %80 = arith.truncf %67 : vector<16x8xf32> to vector<16x8xbf16>
    %cst_25 = arith.constant dense<0.000000e+00> : vector<16x8xf32>
    %81 = tpu.matmul %79, %80, %cst_25 {dimension_numbers = #tpu.dot_dimension_numbers<[1], [0], [0], [1], [0, 0, 1, 1], [], []>} : vector<16x16xbf16>, vector<16x8xbf16>, vector<16x8xf32> -> vector<16x8xf32>
    %82 = tpu.reciprocal %78 {approx = true} : vector<16x1xf32> -> vector<16x1xf32>
    %83 = vector.broadcast %82 : vector<16x1xf32> to vector<16x8xf32>
    %84 = arith.mulf %81, %83 : vector<16x8xf32>
    %c16 = arith.constant 16 : index
    %c0_26 = arith.constant 0 : index
    %85 = vector.load %arg4[%c16, %c0_26] : memref<32x32xf32, #tpu.memory_space<vmem>>, vector<8x32xf32>
    %86 = arith.truncf %84 : vector<16x8xf32> to vector<16x8xbf16>
    %87 = arith.truncf %85 : vector<8x32xf32> to vector<8x32xbf16>
    %cst_27 = arith.constant dense<0.000000e+00> : vector<16x32xf32>
    %88 = tpu.matmul %86, %87, %cst_27 {dimension_numbers = #tpu.dot_dimension_numbers<[1], [0], [0], [1], [0, 0, 1, 1], [], []>} : vector<16x8xbf16>, vector<8x32xbf16>, vector<16x32xf32> -> vector<16x32xf32>
    %89 = arith.addf %64, %88 : vector<16x32xf32>
    %90 = vector.extract_strided_slice %8 {offsets = [0, 24], sizes = [16, 8], strides = [1, 1]} : vector<16x32xf32> to vector<16x8xf32>
    %91 = vector.extract_strided_slice %9 {offsets = [0, 24], sizes = [16, 8], strides = [1, 1]} : vector<16x32xf32> to vector<16x8xf32>
    %92 = vector.extract_strided_slice %10 {offsets = [0, 24], sizes = [16, 8], strides = [1, 1]} : vector<16x32xf32> to vector<16x8xf32>
    %93 = arith.truncf %90 : vector<16x8xf32> to vector<16x8xbf16>
    %94 = arith.truncf %91 : vector<16x8xf32> to vector<16x8xbf16>
    %cst_28 = arith.constant dense<0.000000e+00> : vector<16x16xf32>
    %95 = tpu.matmul %93, %94, %cst_28 {dimension_numbers = #tpu.dot_dimension_numbers<[1], [1], [0], [0], [0, 0, 1, 0], [], []>} : vector<16x8xbf16>, vector<16x8xbf16>, vector<16x16xf32> -> vector<16x16xf32>
    %96 = arith.addf %95, %11 : vector<16x16xf32>
    %cst_29 = arith.constant dense<0xFF800000> : vector<16xf32>
    %97 = vector.multi_reduction <maximumf>, %96, %cst_29 [1] : vector<16x16xf32> to vector<16xf32>
    %98 = vector.shape_cast %97 : vector<16xf32> to vector<16x1xf32>
    %99 = vector.broadcast %98 : vector<16x1xf32> to vector<16x16xf32>
    %100 = arith.subf %96, %99 : vector<16x16xf32>
    %101 = math.exp %100 : vector<16x16xf32>
    %cst_30 = arith.constant dense<0.000000e+00> : vector<16xf32>
    %102 = vector.multi_reduction <add>, %101, %cst_30 [1] : vector<16x16xf32> to vector<16xf32>
    %103 = vector.shape_cast %102 : vector<16xf32> to vector<16x1xf32>
    %104 = arith.truncf %101 : vector<16x16xf32> to vector<16x16xbf16>
    %105 = arith.truncf %92 : vector<16x8xf32> to vector<16x8xbf16>
    %cst_31 = arith.constant dense<0.000000e+00> : vector<16x8xf32>
    %106 = tpu.matmul %104, %105, %cst_31 {dimension_numbers = #tpu.dot_dimension_numbers<[1], [0], [0], [1], [0, 0, 1, 1], [], []>} : vector<16x16xbf16>, vector<16x8xbf16>, vector<16x8xf32> -> vector<16x8xf32>
    %107 = tpu.reciprocal %103 {approx = true} : vector<16x1xf32> -> vector<16x1xf32>
    %108 = vector.broadcast %107 : vector<16x1xf32> to vector<16x8xf32>
    %109 = arith.mulf %106, %108 : vector<16x8xf32>
    %c24 = arith.constant 24 : index
    %c0_32 = arith.constant 0 : index
    %110 = vector.load %arg4[%c24, %c0_32] : memref<32x32xf32, #tpu.memory_space<vmem>>, vector<8x32xf32>
    %111 = arith.truncf %109 : vector<16x8xf32> to vector<16x8xbf16>
    %112 = arith.truncf %110 : vector<8x32xf32> to vector<8x32xbf16>
    %cst_33 = arith.constant dense<0.000000e+00> : vector<16x32xf32>
    %113 = tpu.matmul %111, %112, %cst_33 {dimension_numbers = #tpu.dot_dimension_numbers<[1], [0], [0], [1], [0, 0, 1, 1], [], []>} : vector<16x8xbf16>, vector<8x32xbf16>, vector<16x32xf32> -> vector<16x32xf32>
    %114 = arith.addf %89, %113 : vector<16x32xf32>
    %c0_34 = arith.constant 0 : index
    %c0_35 = arith.constant 0 : index
    %115 = vector.load %arg6[%c0_34, %c0_35] : memref<32x32xf32, #tpu.memory_space<vmem>>, vector<32x32xf32>
    %116 = arith.truncf %114 : vector<16x32xf32> to vector<16x32xbf16>
    %117 = arith.truncf %115 : vector<32x32xf32> to vector<32x32xbf16>
    %cst_36 = arith.constant dense<0.000000e+00> : vector<16x32xf32>
    %118 = tpu.matmul %116, %117, %cst_36 {dimension_numbers = #tpu.dot_dimension_numbers<[1], [0], [0], [1], [0, 0, 1, 1], [], []>} : vector<16x32xbf16>, vector<32x32xbf16>, vector<16x32xf32> -> vector<16x32xf32>
    %c0_37 = arith.constant 0 : index
    %c0_38 = arith.constant 0 : index
    %119 = vector.load %arg7[%c0_37, %c0_38] : memref<1x32xf32, #tpu.memory_space<vmem>>, vector<1x32xf32>
    %120 = vector.broadcast %119 : vector<1x32xf32> to vector<16x32xf32>
    %121 = arith.addf %118, %120 : vector<16x32xf32>
    %cst_39 = arith.constant 0.000000e+00 : f32
    %122 = vector.broadcast %cst_39 : f32 to vector<16x32xf32>
    %123 = arith.maximumf %121, %122 : vector<16x32xf32>
    %c0_40 = arith.constant 0 : index
    %c0_41 = arith.constant 0 : index
    %124 = vector.load %arg8[%c0_40, %c0_41] : memref<32x64xf32, #tpu.memory_space<vmem>>, vector<32x64xf32>
    %125 = arith.truncf %123 : vector<16x32xf32> to vector<16x32xbf16>
    %126 = arith.truncf %124 : vector<32x64xf32> to vector<32x64xbf16>
    %cst_42 = arith.constant dense<0.000000e+00> : vector<16x64xf32>
    %127 = tpu.matmul %125, %126, %cst_42 {dimension_numbers = #tpu.dot_dimension_numbers<[1], [0], [0], [1], [0, 0, 1, 1], [], []>} : vector<16x32xbf16>, vector<32x64xbf16>, vector<16x64xf32> -> vector<16x64xf32>
    %c0_43 = arith.constant 0 : index
    %c0_44 = arith.constant 0 : index
    %128 = vector.load %arg9[%c0_43, %c0_44] : memref<1x64xf32, #tpu.memory_space<vmem>>, vector<1x64xf32>
    %129 = vector.broadcast %128 : vector<1x64xf32> to vector<16x64xf32>
    %130 = arith.addf %127, %129 : vector<16x64xf32>
    %cst_45 = arith.constant 0.000000e+00 : f32
    %131 = vector.broadcast %cst_45 : f32 to vector<16x64xf32>
    %132 = arith.maximumf %130, %131 : vector<16x64xf32>
    %c0_46 = arith.constant 0 : index
    %c0_47 = arith.constant 0 : index
    %133 = vector.load %arg10[%c0_46, %c0_47] : memref<64x128xf32, #tpu.memory_space<vmem>>, vector<64x128xf32>
    %134 = arith.truncf %132 : vector<16x64xf32> to vector<16x64xbf16>
    %135 = arith.truncf %133 : vector<64x128xf32> to vector<64x128xbf16>
    %cst_48 = arith.constant dense<0.000000e+00> : vector<16x128xf32>
    %136 = tpu.matmul %134, %135, %cst_48 {dimension_numbers = #tpu.dot_dimension_numbers<[1], [0], [0], [1], [0, 0, 1, 1], [], []>} : vector<16x64xbf16>, vector<64x128xbf16>, vector<16x128xf32> -> vector<16x128xf32>
    %c0_49 = arith.constant 0 : index
    %c0_50 = arith.constant 0 : index
    %137 = vector.load %arg11[%c0_49, %c0_50] : memref<1x128xf32, #tpu.memory_space<vmem>>, vector<1x128xf32>
    %138 = vector.broadcast %137 : vector<1x128xf32> to vector<16x128xf32>
    %139 = arith.addf %136, %138 : vector<16x128xf32>
    %cst_51 = arith.constant 0.000000e+00 : f32
    %140 = vector.broadcast %cst_51 : f32 to vector<16x128xf32>
    %141 = arith.maximumf %139, %140 : vector<16x128xf32>
    %c0_52 = arith.constant 0 : index
    %c0_53 = arith.constant 0 : index
    %142 = vector.load %arg12[%c0_52, %c0_53] : memref<128x64xf32, #tpu.memory_space<vmem>>, vector<128x64xf32>
    %143 = arith.truncf %141 : vector<16x128xf32> to vector<16x128xbf16>
    %144 = arith.truncf %142 : vector<128x64xf32> to vector<128x64xbf16>
    %cst_54 = arith.constant dense<0.000000e+00> : vector<16x64xf32>
    %145 = tpu.matmul %143, %144, %cst_54 {dimension_numbers = #tpu.dot_dimension_numbers<[1], [0], [0], [1], [0, 0, 1, 1], [], []>} : vector<16x128xbf16>, vector<128x64xbf16>, vector<16x64xf32> -> vector<16x64xf32>
    %c0_55 = arith.constant 0 : index
    %c0_56 = arith.constant 0 : index
    %146 = vector.load %arg13[%c0_55, %c0_56] : memref<1x64xf32, #tpu.memory_space<vmem>>, vector<1x64xf32>
    %147 = vector.broadcast %146 : vector<1x64xf32> to vector<16x64xf32>
    %148 = arith.addf %145, %147 : vector<16x64xf32>
    %cst_57 = arith.constant 0.000000e+00 : f32
    %149 = vector.broadcast %cst_57 : f32 to vector<16x64xf32>
    %150 = arith.maximumf %148, %149 : vector<16x64xf32>
    %c0_58 = arith.constant 0 : index
    %c0_59 = arith.constant 0 : index
    %151 = vector.load %arg14[%c0_58, %c0_59] : memref<64x32xf32, #tpu.memory_space<vmem>>, vector<64x32xf32>
    %152 = arith.truncf %150 : vector<16x64xf32> to vector<16x64xbf16>
    %153 = arith.truncf %151 : vector<64x32xf32> to vector<64x32xbf16>
    %cst_60 = arith.constant dense<0.000000e+00> : vector<16x32xf32>
    %154 = tpu.matmul %152, %153, %cst_60 {dimension_numbers = #tpu.dot_dimension_numbers<[1], [0], [0], [1], [0, 0, 1, 1], [], []>} : vector<16x64xbf16>, vector<64x32xbf16>, vector<16x32xf32> -> vector<16x32xf32>
    %c0_61 = arith.constant 0 : index
    %c0_62 = arith.constant 0 : index
    %155 = vector.load %arg15[%c0_61, %c0_62] : memref<1x32xf32, #tpu.memory_space<vmem>>, vector<1x32xf32>
    %156 = vector.broadcast %155 : vector<1x32xf32> to vector<16x32xf32>
    %157 = arith.addf %154, %156 : vector<16x32xf32>
    %cst_63 = arith.constant 0.000000e+00 : f32
    %158 = vector.broadcast %cst_63 : f32 to vector<16x32xf32>
    %159 = arith.maximumf %157, %158 : vector<16x32xf32>
    %c0_64 = arith.constant 0 : index
    %c0_65 = arith.constant 0 : index
    %160 = vector.load %arg16[%c0_64, %c0_65] : memref<32x16xf32, #tpu.memory_space<vmem>>, vector<32x16xf32>
    %161 = arith.truncf %159 : vector<16x32xf32> to vector<16x32xbf16>
    %162 = arith.truncf %160 : vector<32x16xf32> to vector<32x16xbf16>
    %cst_66 = arith.constant dense<0.000000e+00> : vector<16x16xf32>
    %163 = tpu.matmul %161, %162, %cst_66 {dimension_numbers = #tpu.dot_dimension_numbers<[1], [0], [0], [1], [0, 0, 1, 1], [], []>} : vector<16x32xbf16>, vector<32x16xbf16>, vector<16x16xf32> -> vector<16x16xf32>
    %c0_67 = arith.constant 0 : index
    %c0_68 = arith.constant 0 : index
    %164 = vector.load %arg17[%c0_67, %c0_68] : memref<1x16xf32, #tpu.memory_space<vmem>>, vector<1x16xf32>
    %165 = vector.broadcast %164 : vector<1x16xf32> to vector<16x16xf32>
    %166 = arith.addf %163, %165 : vector<16x16xf32>
    %167 = vector.extract_strided_slice %166 {offsets = [0, 0], sizes = [8, 16], strides = [1, 1]} : vector<16x16xf32> to vector<8x16xf32>
    %168 = vector.extract_strided_slice %166 {offsets = [8, 0], sizes = [8, 16], strides = [1, 1]} : vector<16x16xf32> to vector<8x16xf32>
    %169 = arith.addf %167, %168 : vector<8x16xf32>
    %cst_69 = arith.constant 5.000000e-01 : f32
    %170 = vector.broadcast %cst_69 : f32 to vector<8x16xf32>
    %171 = arith.mulf %169, %170 : vector<8x16xf32>
    %c0_70 = arith.constant 0 : index
    %c0_71 = arith.constant 0 : index
    %172 = vector.load %arg18[%c0_70, %c0_71] : memref<8x16xf32, #tpu.memory_space<vmem>>, vector<8x16xf32>
    tpu.vector_store %arg18[%c0_70, %c0_71], %171 {strides = array<i32>} : memref<8x16xf32, #tpu.memory_space<vmem>>, vector<8x16xf32>,
    return
  }
}

</mosaic_0001>

<bundles_post_ra>
// kernel: mlp_self_forward.1
= control target key start
LH: loop header
LB: loop body
LE: loop exit
PB: predicated region body
PF: predicated region fallthrough
CT: control target
= control target key end

     0   :  { %s1989_s0 = inlined_call_operand.vmem [shape: f32[16,32], index: 0, kind: input, shape index: {}]   ;;  %s1990_s1 = inlined_call_operand.vmem [shape: f32[16,16], index: 1, kind: input, shape index: {}]   ;;  %s1991_s2 = inlined_call_operand.vmem [shape: f32[32,96], index: 2, kind: input, shape index: {}]   ;;  %s1992_s3 = inlined_call_operand.vmem [shape: f32[1,96], index: 3, kind: input, shape index: {}]   ;;  %s1993_s4 = inlined_call_operand.vmem [shape: f32[32,32], index: 4, kind: input, shape index: {}]   ;;  %s1994_s5 = inlined_call_operand.vmem [shape: f32[1,32], index: 5, kind: input, shape index: {}]   ;;  %s1995_s6 = inlined_call_operand.vmem [shape: f32[32,32], index: 6, kind: input, shape index: {}]   ;;  %s1996_s7 = inlined_call_operand.vmem [shape: f32[1,32], index: 7, kind: input, shape index: {}]   ;;  %s1997_s8 = inlined_call_operand.vmem [shape: f32[32,64], index: 8, kind: input, shape index: {}]   ;;  %s1998_s9 = inlined_call_operand.vmem [shape: f32[1,64], index: 9, kind: input, shape index: {}]   ;;  %s1999_s10 = inlined_call_operand.vmem [shape: f32[64,128], index: 10, kind: input, shape index: {}]   ;;  %s2000_s11 = inlined_call_operand.vmem [shape: f32[1,128], index: 11, kind: input, shape index: {}]   ;;  %s2001_s12 = inlined_call_operand.vmem [shape: f32[128,64], index: 12, kind: input, shape index: {}]   ;;  %s2002_s13 = inlined_call_operand.vmem [shape: f32[1,64], index: 13, kind: input, shape index: {}]   ;;  %s2003_s14 = inlined_call_operand.vmem [shape: f32[64,32], index: 14, kind: input, shape index: {}]   ;;  %s2004_s15 = inlined_call_operand.vmem [shape: f32[1,32], index: 15, kind: input, shape index: {}]   ;;  %s2005_s16 = inlined_call_operand.vmem [shape: f32[32,16], index: 16, kind: input, shape index: {}]   ;;  %s2006_s17 = inlined_call_operand.vmem [shape: f32[1,16], index: 17, kind: input, shape index: {}]   ;;  %s2007_s18 = inlined_call_operand.hbm [shape: f32[8,16], index: 18, kind: output, shape index: {}]  }
   0x1   :  { %2011 = sst [smem:[#allocation5_spill]] %s1989_s0 }
   0x2   :  { %2012 = sst [smem:[#allocation6_spill]] %s1990_s1 }
   0x3   :  { %2013 = sst [smem:[#allocation7_spill]] %s1991_s2 }
   0x4   :  { %s2014_s29 = sld [smem:[#allocation7_spill]]  ;;  %v1528_v3 = vmov 0.0   ;;  %vm1529_vm0 = vmmov 0  }
   0x5   :  { %1312 = vmatprep.subr.bf16.mxu0 %v1528_v3  ;;  %1316 = vmatprep.mubr.msk.bf16.mxu0 %vm1529_vm0, %v1528_v3 }
   0x6   :  { %1320 = vmatprep.subr.bf16.mxu1 %v1528_v3  ;;  %1322 = vmatprep.mubr.msk.bf16.mxu1 %vm1529_vm0, %v1528_v3 }
   0xa   :  { %v65_v0 = vld [vmem:[%s2014_s29 + $0x10] sm:$0xff]  ;;  %v66_v1 = vld [vmem:[%s2014_s29 + $0x18] sm:$0xff]  ;;  %v63_v2 = vld [vmem:[%s2014_s29] sm:$0xff] }
   0xb   :  { %v69_v4 = vpack.c.bf16 %v66_v1, %v65_v0  ;;  %v64_v5 = vld [vmem:[%s2014_s29 + $0x8] sm:$0xff] }
   0xc   :  { %23 = vsyncpa [#allocation3], 0  ;;  %v68_v6 = vpack.c.bf16 %v64_v5, %v63_v2  ;;  %s2015_s23 = sld [smem:[#allocation5_spill]]  ;;  %vm77_vm1 = vcmask 261120   ;;  %v1231_v11 = vld [vmem:[%s1992_s3] ss:$0 sm:$0xff] }
   0xd   :  { %1313 = vmatpush3.bf16.msra.mxu0 %v69_v4  ;;  %s1530_s28 = smov 64   ;;  %s1531_s29 = smov 96   ;;  %vm137_vm2 = vcmask 64512   ;;  %vm185_vm3 = vcmask 130048   ;;  %v256_v45 = vld [vmem:[%s1993_s4] sm:$0xff]  ;;  %vm262_vm4 = vcmask 1043456  }
   0xe   :  { %1314 = vmatprep.subr.bf16.mxu0 %v1528_v3  ;;  %s2016_s0 = sld [smem:[#allocation6_spill]]  ;;  %s1532_s20 = smov 88   ;;  %v258_v46 = vpack.c.bf16 %v256_v45, %v256_v45  ;;  %vm968_vm5 = vcmask 523264  }
   0xf   :  { %s1533_s21 = smov 120   ;;  %s1534_s22 = smov 80  }
  0x10   :  { %v264_v47 = vsel %vm262_vm4, %v258_v46, 0  ;;  %s1535_s24 = smov 56   ;;  %s1536_s25 = smov 112  }
  0x11   :  { %1315 = vmatpush3.bf16.msra.mxu0 %v68_v6  ;;  %s1537_s26 = smov 72   ;;  %s1539_s3 = smov 104  }
  0x12   :  { %v1658_v7 = vld [vmem:[%s2015_s23] sm:$0xff]  ;;  %v1663_v8 = vld [vmem:[%s2015_s23 + $0x8] sm:$0xff]  ;;  %1326 = vmatprep.subr.bf16.mxu0 %v1528_v3 }
  0x13   :  { %v67_v9 = vpack.c.bf16 %v1663_v8, %v1658_v7 }
  0x14   :  { %v1689_v21 = vld [vmem:[%s2016_s0] sm:$0xff]  ;;  %v1695_v25 = vld [vmem:[%s2016_s0 + $0x8] sm:$0xff] }
  0x15   :  { %1317 = vmatmul.mubr.msk.bf16.vlgmr.msra.gmra.mxu0 %vm77_vm1, %v67_v9 }
  0x16   :  { %1328 = vmatprep.mubr.msk.bf16.mxu0 %vm1529_vm0, %v1528_v3 }
  0xd5   :  { %v115_v10 = vpop.f32.mrf.mxu0 }
  0xd6   :  { %v116_v14 = vadd.f32 %v1231_v11, %v115_v10 }
  0xd7   :  { %v1318_v12 = vpop.f32.mrf.mxu0 }
  0xd9   :  { %v118_v13 = vpop.f32.mrf.mxu0 }
  0xda   :  { %v119_v15 = vadd.f32 %v1231_v11, %v118_v13 }
  0xdb   :  { %v1319_v16 = vpop.f32.mrf.mxu0 }
  0xdc   :  { %v1675_v17 = vpack.c.bf16 %v119_v15, %v116_v14 }
  0xde   :  { %205 = vrot.lane.b32.xlu1 %v1675_v17, %s1530_s28  ;;  %135 = vrot.lane.b32.xlu0 %v1675_v17, %s1531_s29  ;;  %s1538_s29 = smov 48  }
 0x150   :  { %v206_v18 = vpop.permute.xlu1 %205  ;;  %v136_v19 = vpop.permute.xlu0 %135 }
 0x151   :  { %1327 = vmatpush3.bf16.msra.mxu0 %v206_v18  ;;  %v142_v20 = vsel %vm137_vm2, %v136_v19, 0 }
 0x152   :  { %1321 = vmatpush3.bf16.xpose.msra.mxu1 %v142_v20  ;;  %1338 = vmatprep.subr.bf16.mxu0 %v1528_v3 }
 0x153   :  { %1332 = vmatprep.subr.bf16.mxu1 %v1528_v3 }
 0x159   :  { %1323 = vmatmul.mubr.msk.bf16.vlgmr.msra.gmra.mxu1 %vm137_vm2, %v1675_v17 }
 0x15a   :  { %1334 = vmatprep.mubr.msk.bf16.mxu1 %vm1529_vm0, %v1528_v3  ;;  %1333 = vmatpush3.bf16.msra.mxu1 %v264_v47 }
 0x15b   :  { %1344 = vmatprep.subr.bf16.mxu1 %v1528_v3 }
 0x219   :  { %v178_v22 = vpop.f32.mrf.mxu1 }
 0x21a   :  { %v179_v23 = vadd.f32 %v178_v22, %v1689_v21 }
 0x21b   :  { %v1324_v24 = vpop.f32.mrf.mxu1 }
 0x21c   :  { %v186_v26 = vsel %vm185_vm3, %v179_v23, -inf }
 0x21d   :  { %187 = vmax.xlane.f32.xlu0 %v186_v26  ;;  %v181_v27 = vpop.f32.mrf.mxu1 }
 0x21e   :  { %v182_v28 = vadd.f32 %v181_v27, %v1695_v25 }
 0x21f   :  { %v1325_v29 = vpop.f32.mrf.mxu1 }
 0x220   :  { %v189_v30 = vsel %vm185_vm3, %v182_v28, -inf }
 0x221   :  { %190 = vmax.xlane.f32.xlu1 %v189_v30 }
 0x232   :  { %311 = vrot.lane.b32.xlu1 %v1675_v17, %s1532_s20 }
 0x236   :  { %309 = vrot.lane.b32.xlu1 %v1675_v17, %s1533_s21 }
 0x2a6   :  { %v188_v31 = vpop.xlane.xlu0 %187 }
 0x2a7   :  { %v192_v32 = vsub.f32 %v179_v23, %v188_v31 }
 0x2a9   :  { %v194_v33 = vmul.f32 1.442695, %v192_v32 }
 0x2aa   :  { %v191_v34 = vpop.xlane.xlu1 %190 }
 0x2ab   :  { %1474 = vpow2.f32 %v194_v33  ;;  %v193_v35 = vsub.f32 %v182_v28, %v191_v34  ;;  %v430_v28 = vld [vmem:[%s1993_s4 + $0x8] sm:$0xff] }
 0x2ac   :  { %v432_v29 = vpack.c.bf16 %v430_v28, %v430_v28 }
 0x2ad   :  { %v196_v36 = vmul.f32 1.442695, %v193_v35 }
 0x2ae   :  { %v312_v40 = vpop.permute.xlu1 %311  ;;  %v437_v30 = vsel %vm262_vm4, %v432_v29, 0 }
 0x2af   :  { %1476 = vpow2.f32 %v196_v36  ;;  %v317_v43 = vsel %vm137_vm2, %v312_v40, 0 }
 0x2b2   :  { %v310_v44 = vpop.permute.xlu1 %309 }
 0x2b8   :  { %v1475_v37 = vpop.eup %1474 }
 0x2b9   :  { %v198_v38 = vsel %vm185_vm3, %v1475_v37, 0.0 }
 0x2ba   :  { %199 = vadd.xlane.f32.xlu1 %v198_v38 }
 0x2bc   :  { %v1477_v39 = vpop.eup %1476 }
 0x2bd   :  { %v201_v41 = vsel %vm185_vm3, %v1477_v39, 0.0  ;;  %v204_v42 = vpack.c.bf16 %v1477_v39, %v1475_v37 }
 0x2be   :  { %202 = vadd.xlane.f32.xlu0 %v201_v41 }
 0x2bf   :  { %1329 = vmatmul.mubr.msk.bf16.vlgmr.msra.gmra.mxu0 %vm185_vm3, %v204_v42 }
 0x2c0   :  { %1339 = vmatpush3.bf16.xpose.msra.mxu0 %v317_v43  ;;  %1340 = vmatprep.mubr.msk.bf16.mxu0 %vm1529_vm0, %v1528_v3 }
 0x2c1   :  { %1350 = vmatprep.subr.bf16.mxu0 %v1528_v3 }
 0x2c7   :  { %1341 = vmatmul.mubr.msk.bf16.vlgmr.msra.gmra.mxu0 %vm137_vm2, %v310_v44 }
 0x2c8   :  { %1352 = vmatprep.mubr.msk.bf16.mxu0 %vm1529_vm0, %v1528_v3  ;;  %1351 = vmatpush3.bf16.msra.mxu0 %v437_v30 }
 0x2c9   :  { %1362 = vmatprep.subr.bf16.mxu0 %v1528_v3 }
 0x2cb   :  { %484 = vrot.lane.b32.xlu1 %v1675_v17, %s1534_s22 }
 0x343   :  { %v200_v48 = vpop.xlane.xlu1 %199 }
 0x344   :  { %1478 = vrcp.f32 %v200_v48 }
 0x347   :  { %v203_v49 = vpop.xlane.xlu0 %202  ;;  %v485_v16 = vpop.permute.xlu1 %484 }
 0x348   :  { %1480 = vrcp.f32 %v203_v49  ;;  %v490_v20 = vsel %vm137_vm2, %v485_v16, 0 }
 0x351   :  { %v1479_v52 = vpop.eup %1478 }
 0x355   :  { %v1481_v53 = vpop.eup %1480 }
 0x37f   :  { %v245_v50 = vpop.f32.mrf.mxu0 }
 0x380   :  { %v254_v55 = vmul.f32 %v1479_v52, %v245_v50 }
 0x381   :  { %v1330_v51 = vpop.f32.mrf.mxu0 }
 0x383   :  { %v248_v54 = vpop.f32.mrf.mxu0 }
 0x384   :  { %v255_v56 = vmul.f32 %v1481_v53, %v248_v54 }
 0x385   :  { %v1331_v57 = vpop.f32.mrf.mxu0 }
 0x386   :  { %v257_v58 = vpack.c.bf16 %v255_v56, %v254_v55 }
 0x387   :  { %v353_v59 = vpop.f32.mrf.mxu0 }
 0x388   :  { %v354_v60 = vadd.f32 %v353_v59, %v1689_v21  ;;  %1335 = vmatmul.mubr.msk.bf16.vlgmr.msra.gmra.mxu1 %vm137_vm2, %v257_v58 }
 0x389   :  { %v1342_v61 = vpop.f32.mrf.mxu0  ;;  %1346 = vmatprep.mubr.msk.bf16.mxu1 %vm1529_vm0, %v1528_v3 }
 0x38a   :  { %v360_v62 = vsel %vm185_vm3, %v354_v60, -inf }
 0x38b   :  { %361 = vmax.xlane.f32.xlu0 %v360_v62  ;;  %v356_v63 = vpop.f32.mrf.mxu0 }
 0x38c   :  { %v357_v0 = vadd.f32 %v356_v63, %v1695_v25 }
 0x38d   :  { %v1343_v1 = vpop.f32.mrf.mxu0 }
 0x38e   :  { %v363_v2 = vsel %vm185_vm3, %v357_v0, -inf  ;;  %v1233_v1 = vld [vmem:[%s1994_s5] ss:$0 sm:$0xff]  ;;  %s1540_s5 = smov 40  }
 0x38f   :  { %364 = vmax.xlane.f32.xlu0 %v363_v2  ;;  %v131_v2 = vadd.f32 %v1233_v1, %v1658_v7 }
 0x3a5   :  { %379 = vrot.lane.b32.xlu0 %v1675_v17, %s1535_s24 }
 0x3a9   :  { %482 = vrot.lane.b32.xlu0 %v1675_v17, %s1536_s25 }
 0x414   :  { %v362_v4 = vpop.xlane.xlu0 %361 }
 0x415   :  { %v366_v5 = vsub.f32 %v354_v60, %v362_v4 }
 0x417   :  { %v368_v6 = vmul.f32 1.442695, %v366_v5  ;;  %v132_v5 = vadd.f32 %v1233_v1, %v1663_v8 }
 0x418   :  { %v365_v9 = vpop.xlane.xlu0 %364 }
 0x419   :  { %1482 = vpow2.f32 %v368_v6  ;;  %v367_v10 = vsub.f32 %v357_v0, %v365_v9 }
 0x41b   :  { %v370_v11 = vmul.f32 1.442695, %v367_v10 }
 0x41c   :  { %v380_v12 = vpop.permute.xlu0 %379 }
 0x41d   :  { %1484 = vpow2.f32 %v370_v11  ;;  %1345 = vmatpush3.bf16.msra.mxu1 %v380_v12 }
 0x41e   :  { %1356 = vmatprep.subr.bf16.mxu1 %v1528_v3 }
 0x420   :  { %v483_v22 = vpop.permute.xlu0 %482 }
 0x426   :  { %v1483_v13 = vpop.eup %1482 }
 0x427   :  { %v372_v14 = vsel %vm185_vm3, %v1483_v13, 0.0 }
 0x428   :  { %373 = vadd.xlane.f32.xlu0 %v372_v14 }
 0x42a   :  { %v1485_v15 = vpop.eup %1484 }
 0x42b   :  { %v375_v18 = vsel %vm185_vm3, %v1485_v15, 0.0  ;;  %v378_v19 = vpack.c.bf16 %v1485_v15, %v1483_v13  ;;  %v603_v15 = vld [vmem:[%s1993_s4 + $0x10] sm:$0xff] }
 0x42c   :  { %376 = vadd.xlane.f32.xlu1 %v375_v18  ;;  %v605_v16 = vpack.c.bf16 %v603_v15, %v603_v15 }
 0x42d   :  { %1347 = vmatmul.mubr.msk.bf16.vlgmr.msra.gmra.mxu1 %vm185_vm3, %v378_v19 }
 0x42e   :  { %1357 = vmatpush3.bf16.xpose.msra.mxu1 %v490_v20  ;;  %1358 = vmatprep.mubr.msk.bf16.mxu1 %vm1529_vm0, %v1528_v3  ;;  %v610_v18 = vsel %vm262_vm4, %v605_v16, 0 }
 0x42f   :  { %1368 = vmatprep.subr.bf16.mxu1 %v1528_v3 }
 0x435   :  { %1359 = vmatmul.mubr.msk.bf16.vlgmr.msra.gmra.mxu1 %vm137_vm2, %v483_v22 }
 0x436   :  { %1370 = vmatprep.mubr.msk.bf16.mxu1 %vm1529_vm0, %v1528_v3  ;;  %1369 = vmatpush3.bf16.msra.mxu1 %v610_v18 }
 0x437   :  { %1380 = vmatprep.subr.bf16.mxu1 %v1528_v3 }
 0x43d   :  { %657 = vrot.lane.b32.xlu1 %v1675_v17, %s1537_s26 }
 0x448   :  { %v1739_v23 = vpop.f32.mrf.mxu1 }
 0x449   :  { %v307_v4 = vadd.f32 %v1739_v23, %v131_v2 }
 0x44a   :  { %v1336_v24 = vpop.f32.mrf.mxu1 }
 0x44c   :  { %v1741_v26 = vpop.f32.mrf.mxu1 }
 0x44d   :  { %v308_v11 = vadd.f32 %v1741_v26, %v132_v5  ;;  %v831_v5 = vld [vmem:[%s1995_s6 + $0x18] sm:$0xff] }
 0x44e   :  { %v1337_v27 = vpop.f32.mrf.mxu1 }
 0x4b1   :  { %v374_v31 = vpop.xlane.xlu0 %373 }
 0x4b2   :  { %1486 = vrcp.f32 %v374_v31 }
 0x4b5   :  { %v377_v32 = vpop.xlane.xlu1 %376 }
 0x4b6   :  { %1488 = vrcp.f32 %v377_v32 }
 0x4b9   :  { %v658_v60 = vpop.permute.xlu1 %657 }
 0x4ba   :  { %v663_v63 = vsel %vm137_vm2, %v658_v60, 0 }
 0x4bf   :  { %v1487_v35 = vpop.eup %1486 }
 0x4c3   :  { %v1489_v36 = vpop.eup %1488 }
 0x4ed   :  { %v419_v33 = vpop.f32.mrf.mxu1 }
 0x4ee   :  { %v428_v38 = vmul.f32 %v1487_v35, %v419_v33 }
 0x4ef   :  { %v1348_v34 = vpop.f32.mrf.mxu1 }
 0x4f1   :  { %v422_v37 = vpop.f32.mrf.mxu1 }
 0x4f2   :  { %v429_v39 = vmul.f32 %v1489_v36, %v422_v37 }
 0x4f3   :  { %v1349_v40 = vpop.f32.mrf.mxu1 }
 0x4f4   :  { %v431_v41 = vpack.c.bf16 %v429_v39, %v428_v38 }
 0x4f5   :  { %v526_v42 = vpop.f32.mrf.mxu1 }
 0x4f6   :  { %v527_v43 = vadd.f32 %v526_v42, %v1689_v21  ;;  %1353 = vmatmul.mubr.msk.bf16.vlgmr.msra.gmra.mxu0 %vm137_vm2, %v431_v41 }
 0x4f7   :  { %v1360_v44 = vpop.f32.mrf.mxu1  ;;  %1364 = vmatprep.mubr.msk.bf16.mxu0 %vm1529_vm0, %v1528_v3 }
 0x4f8   :  { %v533_v45 = vsel %vm185_vm3, %v527_v43, -inf }
 0x4f9   :  { %534 = vmax.xlane.f32.xlu0 %v533_v45  ;;  %v529_v46 = vpop.f32.mrf.mxu1 }
 0x4fa   :  { %v530_v47 = vadd.f32 %v529_v46, %v1695_v25 }
 0x4fb   :  { %v1361_v48 = vpop.f32.mrf.mxu1 }
 0x4fc   :  { %v536_v49 = vsel %vm185_vm3, %v530_v47, -inf }
 0x4fd   :  { %537 = vmax.xlane.f32.xlu0 %v536_v49 }
 0x513   :  { %552 = vrot.lane.b32.xlu0 %v1675_v17, %s1538_s29 }
 0x517   :  { %655 = vrot.lane.b32.xlu0 %v1675_v17, %s1539_s3 }
 0x582   :  { %v535_v50 = vpop.xlane.xlu0 %534 }
 0x583   :  { %v539_v51 = vsub.f32 %v527_v43, %v535_v50 }
 0x585   :  { %v541_v52 = vmul.f32 1.442695, %v539_v51 }
 0x586   :  { %v538_v53 = vpop.xlane.xlu0 %537 }
 0x587   :  { %1490 = vpow2.f32 %v541_v52  ;;  %v540_v54 = vsub.f32 %v530_v47, %v538_v53  ;;  %v776_v53 = vld [vmem:[%s1993_s4 + $0x18] sm:$0xff] }
 0x589   :  { %v543_v55 = vmul.f32 1.442695, %v540_v54  ;;  %v778_v54 = vpack.c.bf16 %v776_v53, %v776_v53 }
 0x58a   :  { %v553_v56 = vpop.permute.xlu0 %552 }
 0x58b   :  { %1492 = vpow2.f32 %v543_v55  ;;  %1363 = vmatpush3.bf16.msra.mxu0 %v553_v56  ;;  %v783_v55 = vsel %vm262_vm4, %v778_v54, 0  ;;  %v1023_v54 = vld [vmem:[%s2001_s12 + $0x40] sm:$0xff] }
 0x58c   :  { %1374 = vmatprep.subr.bf16.mxu0 %v1528_v3 }
 0x58e   :  { %v656_v0 = vpop.permute.xlu0 %655 }
 0x594   :  { %v1491_v57 = vpop.eup %1490 }
 0x595   :  { %v545_v58 = vsel %vm185_vm3, %v1491_v57, 0.0 }
 0x596   :  { %546 = vadd.xlane.f32.xlu1 %v545_v58 }
 0x598   :  { %v1493_v59 = vpop.eup %1492 }
 0x599   :  { %v548_v61 = vsel %vm185_vm3, %v1493_v59, 0.0  ;;  %v551_v62 = vpack.c.bf16 %v1493_v59, %v1491_v57 }
 0x59a   :  { %549 = vadd.xlane.f32.xlu0 %v548_v61 }
 0x59b   :  { %1365 = vmatmul.mubr.msk.bf16.vlgmr.msra.gmra.mxu0 %vm185_vm3, %v551_v62 }
 0x59c   :  { %1375 = vmatpush3.bf16.xpose.msra.mxu0 %v663_v63  ;;  %1376 = vmatprep.mubr.msk.bf16.mxu0 %vm1529_vm0, %v1528_v3 }
 0x59d   :  { %1386 = vmatprep.subr.bf16.mxu0 %v1528_v3 }
 0x5a3   :  { %1377 = vmatmul.mubr.msk.bf16.vlgmr.msra.gmra.mxu0 %vm137_vm2, %v656_v0 }
 0x5a4   :  { %1388 = vmatprep.mubr.msk.bf16.mxu0 %vm1529_vm0, %v1528_v3  ;;  %1387 = vmatpush3.bf16.msra.mxu0 %v783_v55  ;;  %v1024_v55 = vld [vmem:[%s2001_s12 + $0x48] sm:$0xff] }
 0x5a5   :  { %1400 = vmatprep.subr.bf16.mxu0 %v1528_v3 }
 0x5b6   :  { %v473_v6 = vpop.f32.mrf.mxu0 }
 0x5b7   :  { %v480_v9 = vadd.f32 %v473_v6, %v307_v4  ;;  %v830_v4 = vld [vmem:[%s1995_s6 + $0x10] sm:$0xff] }
 0x5b8   :  { %v1354_v10 = vpop.f32.mrf.mxu0  ;;  %v834_v6 = vpack.c.bf16 %v831_v5, %v830_v4 }
 0x5b9   :  { %v829_v10 = vld [vmem:[%s1995_s6 + $0x8] sm:$0xff] }
 0x5ba   :  { %v476_v12 = vpop.f32.mrf.mxu0 }
 0x5bb   :  { %v481_v13 = vadd.f32 %v476_v12, %v308_v11 }
 0x5bc   :  { %v1355_v14 = vpop.f32.mrf.mxu0 }
 0x61f   :  { %v547_v7 = vpop.xlane.xlu1 %546 }
 0x620   :  { %1494 = vrcp.f32 %v547_v7 }
 0x623   :  { %v550_v8 = vpop.xlane.xlu0 %549 }
 0x624   :  { %1496 = vrcp.f32 %v550_v8  ;;  %v890_v8 = vld [vmem:[%s1997_s8 + $0x10] sm:$0xff] }
 0x62d   :  { %v1495_v22 = vpop.eup %1494 }
 0x631   :  { %v1497_v23 = vpop.eup %1496 }
 0x65b   :  { %v592_v19 = vpop.f32.mrf.mxu0 }
 0x65c   :  { %v601_v26 = vmul.f32 %v1495_v22, %v592_v19  ;;  %v891_v19 = vld [vmem:[%s1997_s8 + $0x18] sm:$0xff]  ;;  %v888_v22 = vld [vmem:[%s1997_s8] sm:$0xff] }
 0x65d   :  { %v1366_v20 = vpop.f32.mrf.mxu0 }
 0x65e   :  { %v894_v20 = vpack.c.bf16 %v891_v19, %v890_v8  ;;  %v1097_v8 = vld [vmem:[%s2003_s14 + $0x38] sm:$0xff] }
 0x65f   :  { %v595_v24 = vpop.f32.mrf.mxu0 }
 0x660   :  { %v602_v27 = vmul.f32 %v1497_v23, %v595_v24  ;;  %v889_v23 = vld [vmem:[%s1997_s8 + $0x8] sm:$0xff] }
 0x661   :  { %v1367_v28 = vpop.f32.mrf.mxu0  ;;  %v893_v24 = vpack.c.bf16 %v889_v23, %v888_v22 }
 0x662   :  { %v604_v29 = vpack.c.bf16 %v602_v27, %v601_v26  ;;  %v954_v26 = vld [vmem:[%s1999_s10 + $0x30] sm:$0xff]  ;;  %v955_v27 = vld [vmem:[%s1999_s10 + $0x38] sm:$0xff] }
 0x663   :  { %v699_v30 = vpop.f32.mrf.mxu0  ;;  %v960_v28 = vpack.c.bf16 %v955_v27, %v954_v26 }
 0x664   :  { %v700_v31 = vadd.f32 %v699_v30, %v1689_v21  ;;  %1371 = vmatmul.mubr.msk.bf16.vlgmr.msra.gmra.mxu1 %vm137_vm2, %v604_v29  ;;  %v1246_v29 = vld [vmem:[%s1996_s7] ss:$0 sm:$0xff] }
 0x665   :  { %v1378_v32 = vpop.f32.mrf.mxu0  ;;  %1382 = vmatprep.mubr.msk.bf16.mxu1 %vm1529_vm0, %v1528_v3 }
 0x666   :  { %v706_v33 = vsel %vm185_vm3, %v700_v31, -inf }
 0x667   :  { %707 = vmax.xlane.f32.xlu0 %v706_v33  ;;  %v702_v34 = vpop.f32.mrf.mxu0 }
 0x668   :  { %v703_v35 = vadd.f32 %v702_v34, %v1695_v25 }
 0x669   :  { %v1379_v36 = vpop.f32.mrf.mxu0 }
 0x66a   :  { %v709_v37 = vsel %vm185_vm3, %v703_v35, -inf }
 0x66b   :  { %710 = vmax.xlane.f32.xlu1 %v709_v37 }
 0x67d   :  { %725 = vrot.lane.b32.xlu0 %v1675_v17, %s1540_s5 }
 0x6f0   :  { %v708_v21 = vpop.xlane.xlu0 %707 }
 0x6f1   :  { %v712_v38 = vsub.f32 %v700_v31, %v708_v21 }
 0x6f3   :  { %v714_v39 = vmul.f32 1.442695, %v712_v38  ;;  %v952_v38 = vld [vmem:[%s1999_s10 + $0x20] sm:$0xff] }
 0x6f4   :  { %v726_v40 = vpop.permute.xlu0 %725  ;;  %v711_v41 = vpop.xlane.xlu1 %710 }
 0x6f5   :  { %1498 = vpow2.f32 %v714_v39  ;;  %v713_v42 = vsub.f32 %v703_v35, %v711_v41  ;;  %1381 = vmatpush3.bf16.msra.mxu1 %v726_v40  ;;  %v953_v39 = vld [vmem:[%s1999_s10 + $0x28] sm:$0xff]  ;;  %v950_v41 = vld [vmem:[%s1999_s10 + $0x10] sm:$0xff] }
 0x6f6   :  { %1392 = vmatprep.subr.bf16.mxu1 %v1528_v3  ;;  %v959_v40 = vpack.c.bf16 %v953_v39, %v952_v38  ;;  %v1091_v38 = vld [vmem:[%s2003_s14 + $0x8] sm:$0xff] }
 0x6f7   :  { %v716_v43 = vmul.f32 1.442695, %v713_v42  ;;  %v951_v42 = vld [vmem:[%s1999_s10 + $0x18] sm:$0xff] }
 0x6f9   :  { %1500 = vpow2.f32 %v716_v43  ;;  %v958_v43 = vpack.c.bf16 %v951_v42, %v950_v41 }
 0x702   :  { %v1499_v25 = vpop.eup %1498 }
 0x703   :  { %v718_v44 = vsel %vm185_vm3, %v1499_v25, 0.0 }
 0x704   :  { %719 = vadd.xlane.f32.xlu1 %v718_v44  ;;  %v949_v44 = vld [vmem:[%s1999_s10 + $0x8] sm:$0xff] }
 0x706   :  { %v1501_v45 = vpop.eup %1500 }
 0x707   :  { %v721_v46 = vsel %vm185_vm3, %v1501_v45, 0.0  ;;  %v724_v17 = vpack.c.bf16 %v1501_v45, %v1499_v25  ;;  %v948_v25 = vld [vmem:[%s1999_s10] sm:$0xff] }
 0x708   :  { %722 = vadd.xlane.f32.xlu1 %v721_v46  ;;  %v957_v45 = vpack.c.bf16 %v949_v44, %v948_v25  ;;  %v1029_v46 = vld [vmem:[%s2001_s12 + $0x70] sm:$0xff] }
 0x709   :  { %1383 = vmatmul.mubr.msk.bf16.vlgmr.msra.gmra.mxu1 %vm185_vm3, %v724_v17  ;;  %v1030_v17 = vld [vmem:[%s2001_s12 + $0x78] sm:$0xff] }
 0x70a   :  { %1396 = vmatprep.mubr.msk.bf16.mxu1 %vm1529_vm0, %v1528_v3  ;;  %1393 = vmatpush3.bf16.msra.mxu1 %v834_v6 }
 0x70b   :  { %1394 = vmatprep.subr.bf16.mxu1 %v1528_v3 }
 0x724   :  { %v646_v47 = vpop.f32.mrf.mxu1 }
 0x725   :  { %v653_v48 = vadd.f32 %v646_v47, %v480_v9  ;;  %v828_v9 = vld [vmem:[%s1995_s6] sm:$0xff] }
 0x726   :  { %v1372_v49 = vpop.f32.mrf.mxu1  ;;  %v833_v11 = vpack.c.bf16 %v829_v10, %v828_v9  ;;  %v1027_v47 = vld [vmem:[%s2001_s12 + $0x60] sm:$0xff]  ;;  %v1020_v10 = vld [vmem:[%s2001_s12 + $0x28] sm:$0xff] }
 0x727   :  { %v1028_v49 = vld [vmem:[%s2001_s12 + $0x68] sm:$0xff]  ;;  %v1019_v9 = vld [vmem:[%s2001_s12 + $0x20] sm:$0xff] }
 0x728   :  { %v649_v50 = vpop.f32.mrf.mxu1  ;;  %1395 = vmatpush3.bf16.msra.mxu1 %v833_v11  ;;  %v1034_v11 = vpack.c.bf16 %v1020_v10, %v1019_v9 }
 0x729   :  { %v654_v51 = vadd.f32 %v649_v50, %v481_v13  ;;  %1408 = vmatprep.subr.bf16.mxu1 %v1528_v3  ;;  %v1038_v50 = vpack.c.bf16 %v1028_v49, %v1027_v47  ;;  %v1159_v49 = vld [vmem:[%s2005_s16 + $0x18] sm:$0xff] }
 0x72a   :  { %v1373_v52 = vpop.f32.mrf.mxu1 }
 0x72b   :  { %v1026_v52 = vld [vmem:[%s2001_s12 + $0x58] sm:$0xff] }
 0x78d   :  { %v720_v56 = vpop.xlane.xlu1 %719 }
 0x78e   :  { %1502 = vrcp.f32 %v720_v56  ;;  %v1036_v56 = vpack.c.bf16 %v1024_v55, %v1023_v54  ;;  %v1253_v54 = vld [vmem:[%s2004_s15] ss:$0 sm:$0xff]  ;;  %s1541_s15 = smov [#allocation2]  }
 0x78f   :  { %s1223_s26 = sshll.u32 %s1541_s15, 4  ;;  %s1224_s26 = int_to_ptr.vmem [resolvable:$true] %s1223_s26 }
 0x790   :  { %s1506_s27 = scalar_lea.vmem %s1224_s26, 128  ;;  %p1511_p1 = scmp.lt.s32.totalorder %s1224_s26, %s1224_s26 }
 0x791   :  { %v723_v57 = vpop.xlane.xlu1 %722  ;;  %p1507_p0 = scmp.ne.s32.totalorder %s1224_s26, %s1506_s27  ;;  %p1512_p2 = scmp.lt.s32.totalorder %s1506_s27, %s1506_s27 }
 0x792   :  { %1504 = vrcp.f32 %v723_v57  ;;  %v1021_v57 = vld [vmem:[%s2001_s12 + $0x30] sm:$0xff] }
 0x793   :  { %p1513_p3 = por %p1512_p2, %p1511_p1 }
 0x795   :  { %p1514_p4 = pnand %p1513_p3, %p1507_p0 }
 0x79b   :  { %v1503_v60 = vpop.eup %1502 }
 0x79f   :  { %v1505_v61 = vpop.eup %1504 }
 0x7c9   :  { %v765_v58 = vpop.f32.mrf.mxu1 }
 0x7ca   :  { %v774_v63 = vmul.f32 %v1503_v60, %v765_v58  ;;  %v1022_v58 = vld [vmem:[%s2001_s12 + $0x38] sm:$0xff]  ;;  %v1248_v60 = vld [vmem:[%s1998_s9] ss:$0 sm:$0xff] }
 0x7cb   :  { %v1384_v59 = vpop.f32.mrf.mxu1 }
 0x7cc   :  { %v1035_v59 = vpack.c.bf16 %v1022_v58, %v1021_v57 }
 0x7cd   :  { %v768_v62 = vpop.f32.mrf.mxu1 }
 0x7ce   :  { %v775_v0 = vmul.f32 %v1505_v61, %v768_v62 }
 0x7cf   :  { %v1385_v1 = vpop.f32.mrf.mxu1 }
 0x7d0   :  { %v777_v2 = vpack.c.bf16 %v775_v0, %v774_v63 }
 0x7d2   :  { %1389 = vmatmul.mubr.msk.bf16.vlgmr.msra.gmra.mxu0 %vm137_vm2, %v777_v2 }
 0x7d3   :  { %1404 = vmatprep.mubr.msk.bf16.mxu0 %vm1529_vm0, %v1528_v3  ;;  %1401 = vmatpush3.bf16.msra.mxu0 %v894_v20  ;;  %v1250_v20 = vld [vmem:[%s2000_s11] ss:$0 sm:$0xff] }
 0x7d4   :  { %1402 = vmatprep.subr.bf16.mxu0 %v1528_v3 }
 0x7d7   :  { %1403 = vmatpush3.bf16.msra.mxu0 %v893_v24 }
 0x7d8   :  { %1420 = vmatprep.subr.bf16.mxu0 %v1528_v3 }
 0x892   :  { %v819_v12 = vpop.f32.mrf.mxu0 }
 0x893   :  { %v826_v15 = vadd.f32 %v819_v12, %v653_v48  ;;  %v1039_v48 = vpack.c.bf16 %v1030_v17, %v1029_v46  ;;  %v1017_v12 = vld [vmem:[%s2001_s12 + $0x10] sm:$0xff] }
 0x894   :  { %v1390_v13 = vpop.f32.mrf.mxu0 }
 0x895   :  { %v1018_v13 = vld [vmem:[%s2001_s12 + $0x18] sm:$0xff] }
 0x896   :  { %v822_v14 = vpop.f32.mrf.mxu0 }
 0x897   :  { %v827_v16 = vadd.f32 %v822_v14, %v654_v51  ;;  %v1025_v51 = vld [vmem:[%s2001_s12 + $0x50] sm:$0xff]  ;;  %v1033_v14 = vpack.c.bf16 %v1018_v13, %v1017_v12 }
 0x898   :  { %v1391_v18 = vpop.f32.mrf.mxu0  ;;  %v1037_v53 = vpack.c.bf16 %v1026_v52, %v1025_v51  ;;  %v1156_v51 = vld [vmem:[%s2005_s16] sm:$0xff]  ;;  %v1157_v52 = vld [vmem:[%s2005_s16 + $0x8] sm:$0xff] }
 0x899   :  { %v832_v7 = vpack.c.bf16 %v827_v16, %v826_v15  ;;  %v1015_v15 = vld [vmem:[%s2001_s12] sm:$0xff]  ;;  %v1016_v16 = vld [vmem:[%s2001_s12 + $0x8] sm:$0xff] }
 0x89a   :  { %v1032_v18 = vpack.c.bf16 %v1016_v16, %v1015_v15 }
 0x89b   :  { %1397 = vmatmul.mubr.msk.bf16.vlgmr.msra.gmra.mxu1 %vm77_vm1, %v832_v7  ;;  %v1096_v7 = vld [vmem:[%s2003_s14 + $0x30] sm:$0xff] }
 0x89c   :  { %1416 = vmatprep.mubr.msk.bf16.mxu1 %vm1529_vm0, %v1528_v3  ;;  %1409 = vmatpush3.bf16.msra.mxu1 %v960_v28  ;;  %v1102_v19 = vpack.c.bf16 %v1097_v8, %v1096_v7 }
 0x89d   :  { %1410 = vmatprep.subr.bf16.mxu1 %v1528_v3 }
 0x8a0   :  { %1411 = vmatpush3.bf16.msra.mxu1 %v959_v40  ;;  %v1252_v40 = vld [vmem:[%s2002_s13] ss:$0 sm:$0xff] }
 0x8a1   :  { %1412 = vmatprep.subr.bf16.mxu1 %v1528_v3 }
 0x8a4   :  { %1413 = vmatpush3.bf16.msra.mxu1 %v958_v43 }
 0x8a5   :  { %1414 = vmatprep.subr.bf16.mxu1 %v1528_v3 }
 0x8a8   :  { %1415 = vmatpush3.bf16.msra.mxu1 %v957_v45 }
 0x8a9   :  { %1440 = vmatprep.subr.bf16.mxu1 %v1528_v3 }
 0x95b   :  { %v879_v30 = vpop.f32.mrf.mxu1 }
 0x95c   :  { %v880_v32 = vadd.f32 %v1246_v29, %v879_v30 }
 0x95d   :  { %v1398_v31 = vpop.f32.mrf.mxu1 }
 0x95e   :  { %v886_v36 = vmax.f32 %v880_v32, 0.0  ;;  %v1094_v32 = vld [vmem:[%s2003_s14 + $0x20] sm:$0xff] }
 0x95f   :  { %v882_v33 = vpop.f32.mrf.mxu1 }
 0x960   :  { %v883_v34 = vadd.f32 %v1246_v29, %v882_v33  ;;  %v1095_v33 = vld [vmem:[%s2003_s14 + $0x28] sm:$0xff] }
 0x961   :  { %v1399_v35 = vpop.f32.mrf.mxu1 }
 0x962   :  { %v887_v37 = vmax.f32 %v883_v34, 0.0  ;;  %v1101_v34 = vpack.c.bf16 %v1095_v33, %v1094_v32  ;;  %v1092_v35 = vld [vmem:[%s2003_s14 + $0x10] sm:$0xff] }
 0x964   :  { %v892_v21 = vpack.c.bf16 %v887_v37, %v886_v36  ;;  %v1093_v36 = vld [vmem:[%s2003_s14 + $0x18] sm:$0xff] }
 0x965   :  { %v1100_v37 = vpack.c.bf16 %v1093_v36, %v1092_v35 }
 0x966   :  { %1405 = vmatmul.mubr.msk.bf16.vlgmr.msra.gmra.mxu0 %vm77_vm1, %v892_v21  ;;  %v1090_v21 = vld [vmem:[%s2003_s14] sm:$0xff] }
 0x967   :  { %1436 = vmatprep.mubr.msk.bf16.mxu0 %vm1529_vm0, %v1528_v3  ;;  %1421 = vmatpush3.bf16.msra.mxu0 %v1039_v48  ;;  %v1099_v39 = vpack.c.bf16 %v1091_v38, %v1090_v21  ;;  %v1158_v48 = vld [vmem:[%s2005_s16 + $0x10] sm:$0xff] }
 0x968   :  { %1422 = vmatprep.subr.bf16.mxu0 %v1528_v3 }
 0x96b   :  { %1423 = vmatpush3.bf16.msra.mxu0 %v1038_v50  ;;  %v1162_v50 = vpack.c.bf16 %v1159_v49, %v1158_v48 }
 0x96c   :  { %1424 = vmatprep.subr.bf16.mxu0 %v1528_v3 }
 0x96f   :  { %1425 = vmatpush3.bf16.msra.mxu0 %v1037_v53  ;;  %v1161_v53 = vpack.c.bf16 %v1157_v52, %v1156_v51 }
 0x970   :  { %1426 = vmatprep.subr.bf16.mxu0 %v1528_v3 }
 0x973   :  { %1427 = vmatpush3.bf16.msra.mxu0 %v1036_v56 }
 0x974   :  { %1428 = vmatprep.subr.bf16.mxu0 %v1528_v3 }
 0x977   :  { %1429 = vmatpush3.bf16.msra.mxu0 %v1035_v59 }
 0x978   :  { %1430 = vmatprep.subr.bf16.mxu0 %v1528_v3 }
 0x97b   :  { %1431 = vmatpush3.bf16.msra.mxu0 %v1034_v11 }
 0x97c   :  { %1432 = vmatprep.subr.bf16.mxu0 %v1528_v3 }
 0x97f   :  { %1433 = vmatpush3.bf16.msra.mxu0 %v1033_v14 }
 0x980   :  { %1434 = vmatprep.subr.bf16.mxu0 %v1528_v3 }
 0x983   :  { %1435 = vmatpush3.bf16.msra.mxu0 %v1032_v18 }
 0xa26   :  { %v939_v61 = vpop.f32.mrf.mxu0 }
 0xa27   :  { %v940_v63 = vadd.f32 %v1248_v60, %v939_v61 }
 0xa28   :  { %v1406_v62 = vpop.f32.mrf.mxu0 }
 0xa29   :  { %v946_v4 = vmax.f32 %v940_v63, 0.0 }
 0xa2a   :  { %v942_v0 = vpop.f32.mrf.mxu0 }
 0xa2b   :  { %v943_v1 = vadd.f32 %v1248_v60, %v942_v0  ;;  %v1255_v0 = vld [vmem:[%s2006_s17] ss:$0 sm:$0xff] }
 0xa2c   :  { %v1407_v2 = vpop.f32.mrf.mxu0 }
 0xa2d   :  { %v947_v5 = vmax.f32 %v943_v1, 0.0 }
 0xa2f   :  { %v956_v6 = vpack.c.bf16 %v947_v5, %v946_v4 }
 0xa31   :  { %1417 = vmatmul.mubr.msk.bf16.vlgmr.msra.gmra.mxu1 %vm968_vm5, %v956_v6 }
 0xa32   :  { %1448 = vmatprep.mubr.msk.bf16.mxu1 %vm1529_vm0, %v1528_v3  ;;  %1441 = vmatpush3.bf16.msra.mxu1 %v1102_v19 }
 0xa33   :  { %1442 = vmatprep.subr.bf16.mxu1 %v1528_v3 }
 0xa36   :  { %1443 = vmatpush3.bf16.msra.mxu1 %v1101_v34 }
 0xa37   :  { %1444 = vmatprep.subr.bf16.mxu1 %v1528_v3 }
 0xa3a   :  { %1445 = vmatpush3.bf16.msra.mxu1 %v1100_v37 }
 0xa3b   :  { %1446 = vmatprep.subr.bf16.mxu1 %v1528_v3 }
 0xa3e   :  { %1447 = vmatpush3.bf16.msra.mxu1 %v1099_v39 }
 0xa3f   :  { %1452 = vmatprep.subr.bf16.mxu1 %v1528_v3 }
 0xaf1   :  { %v1006_v22 = vpop.f32.mrf.mxu1 }
 0xaf2   :  { %v1007_v24 = vadd.f32 %v1250_v20, %v1006_v22 }
 0xaf3   :  { %v1418_v23 = vpop.f32.mrf.mxu1 }
 0xaf4   :  { %v1013_v29 = vmax.f32 %v1007_v24, 0.0 }
 0xaf5   :  { %v1009_v26 = vpop.f32.mrf.mxu1 }
 0xaf6   :  { %v1010_v27 = vadd.f32 %v1250_v20, %v1009_v26 }
 0xaf7   :  { %v1419_v28 = vpop.f32.mrf.mxu1 }
 0xaf8   :  { %v1014_v30 = vmax.f32 %v1010_v27, 0.0 }
 0xafa   :  { %v1031_v31 = vpack.c.bf16 %v1014_v30, %v1013_v29 }
 0xafc   :  { %1437 = vmatmul.mubr.bf16.vlgmr.msra.gmra.mxu0 %v1031_v31 }
 0xbbc   :  { %v1081_v41 = vpop.f32.mrf.mxu0 }
 0xbbd   :  { %v1082_v43 = vadd.f32 %v1252_v40, %v1081_v41 }
 0xbbe   :  { %v1438_v42 = vpop.f32.mrf.mxu0 }
 0xbbf   :  { %v1088_v46 = vmax.f32 %v1082_v43, 0.0 }
 0xbc0   :  { %v1084_v25 = vpop.f32.mrf.mxu0 }
 0xbc1   :  { %v1085_v44 = vadd.f32 %v1252_v40, %v1084_v25 }
 0xbc2   :  { %v1439_v45 = vpop.f32.mrf.mxu0 }
 0xbc3   :  { %v1089_v17 = vmax.f32 %v1085_v44, 0.0 }
 0xbc5   :  { %v1098_v47 = vpack.c.bf16 %v1089_v17, %v1088_v46 }
 0xbc7   :  { %1449 = vmatmul.mubr.msk.bf16.vlgmr.msra.gmra.mxu1 %vm968_vm5, %v1098_v47 }
 0xbc8   :  { %1456 = vmatprep.mubr.msk.bf16.mxu1 %vm1529_vm0, %v1528_v3  ;;  %1453 = vmatpush3.bf16.msra.mxu1 %v1162_v50 }
 0xbc9   :  { %1454 = vmatprep.subr.bf16.mxu1 %v1528_v3 }
 0xbcc   :  { %1455 = vmatpush3.bf16.msra.mxu1 %v1161_v53 }
 0xc87   :  { %v1147_v55 = vpop.f32.mrf.mxu1 }
 0xc88   :  { %v1148_v57 = vadd.f32 %v1253_v54, %v1147_v55 }
 0xc89   :  { %v1450_v56 = vpop.f32.mrf.mxu1 }
 0xc8a   :  { %v1154_v60 = vmax.f32 %v1148_v57, 0.0 }
 0xc8b   :  { %v1150_v58 = vpop.f32.mrf.mxu1 }
 0xc8c   :  { %v1151_v59 = vadd.f32 %v1253_v54, %v1150_v58 }
 0xc8d   :  { %v1451_v3 = vpop.f32.mrf.mxu1 }
 0xc8e   :  { %v1155_v61 = vmax.f32 %v1151_v59, 0.0 }
 0xc90   :  { %v1160_v62 = vpack.c.bf16 %v1155_v61, %v1154_v60 }
 0xc92   :  { %1457 = vmatmul.mubr.msk.bf16.vlgmr.msra.gmra.mxu1 %vm77_vm1, %v1160_v62 }
 0xd52   :  { %v1207_v63 = vpop.f32.mrf.mxu1 }
 0xd53   :  { %v1208_v4 = vadd.f32 %v1255_v0, %v1207_v63 }
 0xd54   :  { %v1458_v1 = vpop.f32.mrf.mxu1 }
 0xd56   :  { %v1210_v2 = vpop.f32.mrf.mxu1 }
 0xd57   :  { %v1211_v5 = vadd.f32 %v1255_v0, %v1210_v2 }
 0xd58   :  { %v1459_v6 = vpop.f32.mrf.mxu1 }
 0xd59   :  { %v1214_v9 = vadd.f32 %v1211_v5, %v1208_v4 }
 0xd5b   :  { %v1215_v10 = vmul.f32 0.5, %v1214_v9 }
 0xd5d   :  { %1216 = vst.msk [vmem:[#allocation2] sm:$0xff] %vm185_vm3, %v1215_v10 }
 0xd5e   :  { %1517 = shalt.err (!%p1514_p4)
}
 0xd5f   :  { %1226 = dma.vmem_to_hbm [thread:$0]  %s1224_s26, 128, %s2007_s18, [#allocation3]  }
 0xd60   :  { %1526 = dma.done.wait [#allocation3], 128  }
 0xd61   :  { %1527 = vsyncadd [#allocation3], 4294967168 }
 0xd62   :  { %1230 = vsyncpa [#allocation3], 1 }

</bundles_post_ra>
